<compile_context>
chip_gen: v6e
topology: v6e:2x2x1
jax: 0.10.0
libtpu: 0.0.40
codegen_flags: <defaults>
</compile_context>

<pallas_src>
import jax
import jax.numpy as jnp
from jax.experimental import pallas as pl
from jax.experimental.pallas import tpu as pltpu


def linear_kernel(w_ref, b_ref, xT_ref, oT_ref):
    """One (2, TILE_B) output tile of y^T = W @ x^T + b.

    w_ref:  (6,)        f32 SMEM  (PyTorch nn.Linear weight (2,3), row-major flattened)
    b_ref:  (2,)        f32 SMEM
    xT_ref: (3, TILE_B) f32 VMEM  (batch on the lane axis -> dense vregs)
    oT_ref: (2, TILE_B) f32 VMEM  (lane-dense stores)
    """
    x0 = xT_ref[0:1, :]          # (1, TILE_B)
    x1 = xT_ref[1:2, :]
    x2 = xT_ref[2:3, :]
    # K=3, N=2: contraction as broadcast FMAs on the VPU (scalar weights from SMEM).
    y0 = x0 * w_ref[0] + x1 * w_ref[1] + x2 * w_ref[2] + b_ref[0]
    y1 = x0 * w_ref[3] + x1 * w_ref[4] + x2 * w_ref[5] + b_ref[1]
    # Single store of the whole output tile.
    oT_ref[...] = jnp.concatenate([y0, y1], axis=0).astype(oT_ref.dtype)


def net_forward(x, weight, bias, *, tile_b=512):
    """x: (B, 3) f32; weight: (2, 3) f32 (PyTorch layout); bias: (2,) f32."""
    B, K = x.shape
    assert K == 3 and weight.shape == (2, 3) and bias.shape == (2,)

    # Lane-dense layout: put the batch dimension on the last (lane) axis.
    xT = x.T                                        # (3, B)
    b_pad = pl.cdiv(B, tile_b) * tile_b
    if b_pad != B:
        xT = jnp.pad(xT, ((0, 0), (0, b_pad - B)))  # zero-pad; padded cols dropped below
    num_tiles = b_pad // tile_b

    w_flat = weight.reshape(6)                      # 1-D SMEM: 32 B instead of a padded [8,128] tile

    bytes_accessed = 4 * (3 * b_pad + 2 * b_pad + 6 + 2)  # x + y + W + b (f32)
    out_T = pl.pallas_call(
        linear_kernel,
        out_shape=jax.ShapeDtypeStruct((2, b_pad), x.dtype),
        grid_spec=pltpu.PrefetchScalarGridSpec(
            num_scalar_prefetch=0,
            grid=(num_tiles,),
            in_specs=[
                pl.BlockSpec(memory_space=pltpu.MemorySpace.SMEM),  # weight (6,)
                pl.BlockSpec(memory_space=pltpu.MemorySpace.SMEM),  # bias   (2,)
                pl.BlockSpec((3, tile_b), lambda i: (0, i)),        # x^T tile
            ],
            out_specs=pl.BlockSpec((2, tile_b), lambda i: (0, i)),  # y^T tile
        ),
        compiler_params=pltpu.CompilerParams(
            # Independent output tiles: let megacore (v7x) shard the batch axis.
            dimension_semantics=("parallel",),
        ),
        cost_estimate=pl.CostEstimate(
            flops=2 * b_pad * 3 * 2,
            transcendentals=0,
            bytes_accessed=bytes_accessed,
        ),
    )(w_flat, bias, xT)

    return out_T[:, :B].T                           # (B, 2)


if __name__ == "__main__":
    key = jax.random.PRNGKey(0)
    kx, kw, kb = jax.random.split(key, 3)

    # Deterministic parameters in PyTorch layout: W (out=2, in=3), b (2,).
    weight = jax.random.normal(kw, (2, 3), dtype=jnp.float32) * 0.1
    bias = jax.random.normal(kb, (2,), dtype=jnp.float32) * 0.1

    # Batch deliberately not a multiple of tile_b to exercise the padded final
    # tile and a 2-step grid (tile_b=512 -> pad to 1024).
    B = 1000
    x = jax.random.normal(kx, (B, 3), dtype=jnp.float32)

    y = net_forward(x, weight, bias, tile_b=512)
    y = jax.block_until_ready(y)

    # Correctness check against plain-JAX reference of nn.Linear semantics.
    y_ref = x @ weight.T + bias
    assert y.shape == (B, 2)
    assert jnp.allclose(y, y_ref, atol=1e-5, rtol=1e-5), "mismatch vs reference"

    print("KERNEL_OK")
</pallas_src>

<mosaic_0001>
module attributes {stable_mosaic.version = 11 : i64} {
  func.func @linear_kernel(%arg0: i32, %arg1: memref<6xf32, #tpu.memory_space<smem>>, %arg2: memref<2xf32, #tpu.memory_space<smem>>, %arg3: memref<3x512xf32, #tpu.memory_space<vmem>>, %arg4: memref<2x512xf32, #tpu.memory_space<vmem>>) attributes {dimension_semantics = [#tpu.dimension_semantics<parallel>], iteration_bounds = array<i64: 2>, scalar_prefetch = 0 : i64, scratch_operands = 0 : i64, tpu.core_type = #tpu.core_type<tc>, window_params = [{transform_indices = @transform_0, window_bounds = array<i64: 6>}, {transform_indices = @transform_1, window_bounds = array<i64: 2>}, {transform_indices = @transform_2, window_bounds = array<i64: 3, 512>}, {transform_indices = @transform_3, window_bounds = array<i64: 2, 512>}]} {
    %c0 = arith.constant 0 : index
    %c0_0 = arith.constant 0 : index
    %0 = vector.load %arg3[%c0, %c0_0] : memref<3x512xf32, #tpu.memory_space<vmem>>, vector<1x512xf32>
    %c1 = arith.constant 1 : index
    %c0_1 = arith.constant 0 : index
    %1 = vector.load %arg3[%c1, %c0_1] : memref<3x512xf32, #tpu.memory_space<vmem>>, vector<1x512xf32>
    %c2 = arith.constant 2 : index
    %c0_2 = arith.constant 0 : index
    %2 = vector.load %arg3[%c2, %c0_2] : memref<3x512xf32, #tpu.memory_space<vmem>>, vector<1x512xf32>
    %c0_3 = arith.constant 0 : index
    %3 = memref.load %arg1[%c0_3] : memref<6xf32, #tpu.memory_space<smem>>
    %4 = vector.broadcast %3 : f32 to vector<1x512xf32>
    %5 = arith.mulf %0, %4 : vector<1x512xf32>
    %c1_4 = arith.constant 1 : index
    %6 = memref.load %arg1[%c1_4] : memref<6xf32, #tpu.memory_space<smem>>
    %7 = vector.broadcast %6 : f32 to vector<1x512xf32>
    %8 = arith.mulf %1, %7 : vector<1x512xf32>
    %9 = arith.addf %5, %8 : vector<1x512xf32>
    %c2_5 = arith.constant 2 : index
    %10 = memref.load %arg1[%c2_5] : memref<6xf32, #tpu.memory_space<smem>>
    %11 = vector.broadcast %10 : f32 to vector<1x512xf32>
    %12 = arith.mulf %2, %11 : vector<1x512xf32>
    %13 = arith.addf %9, %12 : vector<1x512xf32>
    %c0_6 = arith.constant 0 : index
    %14 = memref.load %arg2[%c0_6] : memref<2xf32, #tpu.memory_space<smem>>
    %15 = vector.broadcast %14 : f32 to vector<1x512xf32>
    %16 = arith.addf %13, %15 : vector<1x512xf32>
    %c3 = arith.constant 3 : index
    %17 = memref.load %arg1[%c3] : memref<6xf32, #tpu.memory_space<smem>>
    %18 = vector.broadcast %17 : f32 to vector<1x512xf32>
    %19 = arith.mulf %0, %18 : vector<1x512xf32>
    %c4 = arith.constant 4 : index
    %20 = memref.load %arg1[%c4] : memref<6xf32, #tpu.memory_space<smem>>
    %21 = vector.broadcast %20 : f32 to vector<1x512xf32>
    %22 = arith.mulf %1, %21 : vector<1x512xf32>
    %23 = arith.addf %19, %22 : vector<1x512xf32>
    %c5 = arith.constant 5 : index
    %24 = memref.load %arg1[%c5] : memref<6xf32, #tpu.memory_space<smem>>
    %25 = vector.broadcast %24 : f32 to vector<1x512xf32>
    %26 = arith.mulf %2, %25 : vector<1x512xf32>
    %27 = arith.addf %23, %26 : vector<1x512xf32>
    %c1_7 = arith.constant 1 : index
    %28 = memref.load %arg2[%c1_7] : memref<2xf32, #tpu.memory_space<smem>>
    %29 = vector.broadcast %28 : f32 to vector<1x512xf32>
    %30 = arith.addf %27, %29 : vector<1x512xf32>
    %31 = tpu.concatenate %16, %30 in 0 : vector<1x512xf32>, vector<1x512xf32> -> vector<2x512xf32>
    %c0_8 = arith.constant 0 : index
    %c0_9 = arith.constant 0 : index
    %32 = vector.load %arg4[%c0_8, %c0_9] : memref<2x512xf32, #tpu.memory_space<vmem>>, vector<2x512xf32>
    tpu.vector_store %arg4[%c0_8, %c0_9], %31 {strides = array<i32>} : memref<2x512xf32, #tpu.memory_space<vmem>>, vector<2x512xf32>,
    return
  }
  func.func @transform_0(%arg0: i32) -> i32 {
    %c0_i32 = arith.constant 0 : i32
    %c0_i32_0 = arith.constant 0 : i32
    return %c0_i32 : i32
  }
  func.func @transform_1(%arg0: i32) -> i32 {
    %c0_i32 = arith.constant 0 : i32
    %c0_i32_0 = arith.constant 0 : i32
    return %c0_i32 : i32
  }
  func.func @transform_2(%arg0: i32) -> (i32, i32) {
    %c0_i32 = arith.constant 0 : i32
    %c0_i32_0 = arith.constant 0 : i32
    return %c0_i32, %arg0 : i32, i32
  }
  func.func @transform_3(%arg0: i32) -> (i32, i32) {
    %c0_i32 = arith.constant 0 : i32
    %c0_i32_0 = arith.constant 0 : i32
    return %c0_i32, %arg0 : i32, i32
  }
}

</mosaic_0001>

<bundles_post_ra>
// kernel: tpu_custom_call.1
= control target key start
LH: loop header
LB: loop body
LE: loop exit
PB: predicated region body
PF: predicated region fallthrough
CT: control target
= control target key end

     0   :  { %8 = vsyncpa [#allocation5], 0  ;;  %s851_s0 = inlined_call_operand.hbm [shape: f32[6], index: 0, kind: input, shape index: {}]   ;;  %s852_s1 = inlined_call_operand.vmem [shape: f32[2], index: 1, kind: input, shape index: {}]   ;;  %s853_s2 = inlined_call_operand.hbm [shape: f32[3,1024], index: 2, kind: input, shape index: {}]   ;;  %s854_s3 = inlined_call_operand.hbm [shape: f32[2,1024], index: 3, kind: output, shape index: {}]  }
   0x1   :  { %9 = vsyncpa [#allocation6], 0 }
   0x2   :  { %10 = vsyncpa [#allocation3], 0 }
   0x3   :  { %12 = vsyncpa [#allocation3 + $0x1], 0 }
   0x4   :  { %13 = vsyncpa [#allocation4], 0 }
   0x5   :  { %15 = vsyncpa [#allocation4 + $0x1], 0  ;;  %s675_s12 = smov 0   ;;  %s677_s13 = smov 0  }
   0x6   :  { %s679_s14 = smov 0   ;;  %s681_s15 = smov 0  }
   0x7 LB: > { %s696_s16 = sadd.s32 4294967295, %s648_s15   ;;  %s426_s17 = sadd.s32 4294967294, %s648_s15   ;;  %s648_s15 = sphi %s681_s15, %s878_s15   ;;  %s644_s14 = sphi %s679_s14, %s877_s14   ;;  %s640_s13 = sphi %s677_s13, %s876_s13   ;;  %s636_s12 = sphi %s675_s12, %s875_s12  }
   0x8   : > { %p83_p0 = scmp.ne.s32.totalorder %s640_s13, %s636_s12  ;;  %p855_p1 = scmp.eq.s32.totalorder %s696_s16, 0 }
   0x9   : > { %p107_p2 = scmp.eq.s32.totalorder %s696_s16, 1  ;;  %p113_p3 = scmp.eq.s32.totalorder %s426_s17, 1 }
   0xa   : > { %p705_p4 = por %p855_p1, %p83_p0  ;;  %p427_p5 = scmp.ge.s32.totalorder %s648_s15, 1 }
   0xb   : > { %p710_p6 = por %p113_p3, %p83_p0  ;;  %p120_p7 = scmp.lt.s32.totalorder %s648_s15, 3 }
   0xc   : > { %s859_s18 = scalar_select %p705_p4, 1, 0 }
   0xd   : > { %s860_s19 = scalar_select %p710_p6, 1, 0 }
   0xe   : > { %p715_p8 = pnand %p427_p5, %p120_p7  ;;  %s142_s23 = sshll.u32 %s852_s1, 4  ;;  %s143_s23 = int_to_ptr.vmem [resolvable:$true] %s142_s23 }
   0xf   : > { %s726_s24 = sadd.s32 1, %s648_s15   ;;  %s70_s27 = sadd.s32 1, %s644_s14 }
  0x10   : > { %s861_s20 = scalar_select %p715_p8, 1, 0 }
  0x11   : > { %p466_p10 = pneg %p715_p8  ;;  %s67_s26 = ssub.s32 %s648_s15, %s726_s24 }
  0x12   : > { %p737_p12 = scmp.eq.s32.totalorder %s67_s26, 0  ;;  %s650_s29 = smov [#allocation2]  }
  0x13   : > { %p730_p11 = pnand %p466_p10, %p855_p1  ;;  %s533_s5 = scalar_lea.vmem %s143_s23, 16 }
  0x14   : > { %p534_p13 = scmp.ne.s32.totalorder %s143_s23, %s533_s5  ;;  %p541_p7 = scmp.lt.s32.totalorder %s143_s23, %s143_s23 }
  0x15   : > { %469 = dma.hbm_to_smem (!%p730_p11), %s851_s0, 16, %s650_s29, [#allocation5]  }
  0x16   : > { %p535_p0 = pneg %p730_p11  ;;  %p542_p10 = scmp.lt.s32.totalorder %s533_s5, %s533_s5 }
  0x18   : > { %p536_p3 = pnand %p535_p0, %p534_p13  ;;  %p543_p9 = por %p542_p10, %p541_p7 }
  0x1a   : > { %p537_p5 = pneg %p536_p3 }
  0x1c   : > { %p544_p1 = pnand %p543_p9, %p537_p5 }
  0x1e   : > { %547 = shalt.err (!%p544_p1)
}
  0x1f   : > { %s651_s6 = smov [#allocation7]   ;;  %p77_p13 = scmp.ne.s32.totalorder %s644_s14, %s640_s13 }
  0x20   : > { %472 = dma.vmem_to_smem (!%p730_p11), %s143_s23, 16, %s651_s6, [#allocation6]  }
  0x21   : > { %s753_s7 = scalar_select %p737_p12, %s644_s14, %s70_s27  }
  0x22   : > { %p78_p0 = scmp.eq.s32.totalorder %s648_s15, 0  ;;  %p483_p9 = scmp.lt.s32.totalorder %s648_s15, 2 }
  0x23   : > { %s153_s8 = sand.u32 1, %s644_s14   ;;  %p762_p3 = por %p107_p2, %p77_p13 }
  0x24   : > { %p79_p1 = por %p78_p0, %p77_p13  ;;  %s431_s10 = sshll.u32 %s153_s8, 4 }
  0x25   : > { %s864_s9 = scalar_select %p762_p3, 1, 0 }
  0x26   : > { %s452_s11 = sshll.u32 %s648_s15, 8  ;;  %s157_s23 = scalar_lea.vmem [#allocation8], %s431_s10 }
  0x27   : > { %s770_s22 = scalar_lea.hbm %s853_s2, %s452_s11  ;;  %s165_s25 = sshll.u32 %s157_s23, 4  ;;  %s166_s25 = int_to_ptr.vmem [resolvable:$true] %s165_s25 }
  0x28   : > { %p772_p11 = pnand %p483_p9, %p79_p1  ;;  %s154_s27 = scalar_lea.sflag [#allocation3], %s153_s8 }
  0x29   : > { %s548_s28 = scalar_lea.hbm %s770_s22, 256  ;;  %s553_s4 = scalar_lea.hbm %s853_s2, 512 }
  0x2a   : > { %p549_p2 = scmp.ne.s32.totalorder %s770_s22, %s548_s28  ;;  %p550_p12 = pneg %p772_p11 }
  0x2b   : > { %p554_p10 = scmp.lt.s32.totalorder %s770_s22, %s853_s2  ;;  %p555_p13 = scmp.lt.s32.totalorder %s553_s4, %s548_s28 }
  0x2c   : > { %p551_p5 = pnand %p550_p12, %p549_p2 }
  0x2d   : > { %p556_p0 = por %p555_p13, %p554_p10 }
  0x2e   : > { %p552_p7 = pneg %p551_p5 }
  0x30   : > { %p557_p9 = pnand %p556_p0, %p552_p7 }
  0x32   : > { %560 = shalt.err (!%p557_p9)
}
  0x33   : > { %s561_s10 = scalar_lea.vmem %s166_s25, 256  ;;  %s652_s8 = smov [#allocation8]  }
  0x34   : > { %p562_p1 = scmp.ne.s32.totalorder %s166_s25, %s561_s10  ;;  %s566_s11 = sshll.u32 %s652_s8, 4  ;;  %s567_s11 = int_to_ptr.vmem [resolvable:$false] %s566_s11 }
  0x35   : > { %s568_s17 = scalar_lea.vmem %s567_s11, 512  ;;  %p569_p2 = scmp.lt.s32.totalorder %s166_s25, %s567_s11 }
  0x36   : > { %p564_p6 = pnand %p562_p1, %p550_p12  ;;  %p570_p5 = scmp.lt.s32.totalorder %s568_s17, %s561_s10 }
  0x38   : > { %p565_p3 = pneg %p564_p6  ;;  %p571_p4 = por %p570_p5, %p569_p2 }
  0x3a   : > { %p572_p8 = pnand %p571_p4, %p565_p3 }
  0x3c   : > { %575 = shalt.err (!%p572_p8)
}
  0x3d   : > { %476 = dma.hbm_to_vmem [thread:$0]  (!%p772_p11), %s770_s22, 256, %s166_s25, %s154_s27  }
  0x3e   : > { %p866_p7 = scmp.ne.s32.totalorder %s861_s20, 0 }
  0x3f   : > { %p867_p10 = scmp.eq.s32.totalorder (!%p866_p7), %s696_s16, 0 }
  0x40   : > { %174 = sbr.rel (%p866_p7) target bundleno = 122 (0x7a), region = 32 }
  0x45   : > { %619 = dma.done.wait (%p867_p10), [#allocation5], 16   ;;  %p868_p6 = pmov %p867_p10 }
  0x47   : > { %621 = vsyncadd (%p868_p6), [#allocation5], 4294967280  ;;  %p869_p12 = pmov %p868_p6 }
  0x48   : > { %p870_p13 = pmov %p868_p6 }
  0x49   : > { %623 = dma.done.wait (%p869_p12), [#allocation6], 16  }
  0x4a   : > { %625 = vsyncadd (%p870_p13), [#allocation6], 4294967280  ;;  %s801_s21 = sand.u32 1, %s640_s13   ;;  %p871_p4 = scmp.ne.s32.totalorder %s859_s18, 0 }
  0x4b   : > { %s437_s20 = sshll.u32 %s801_s21, 4  ;;  %s185_s22 = scalar_lea.sflag [#allocation3], %s801_s21 }
  0x4c   : > { %s188_s23 = scalar_lea.vmem [#allocation8], %s437_s20 }
  0x4d   : > { %627 = dma.done.wait (%p871_p4), %s185_s22, 256  }
  0x4e   : > { %629 = vsyncadd (%p871_p4), %s185_s22, 4294967040 }
  0x4f   : > { %193 = sfence }
  0x50   : > { %s219_s25 = sld [smem:[#allocation2]]  ;;  %v214_v0 = vld [vmem:[%s188_s23] ss:$4 sm:$0xf]  ;;  %v248_v2 = vlaneseq  ;;  %v653_v22 = vmov 1983009808  }
  0x51   : > { %s441_s26 = sld [smem:[#allocation2 + $0x1]]  ;;  %v439_v1 = vld [vmem:[%s188_s23 + $0x1] ss:$4 sm:$0xf]  ;;  %v301_v23 = vunpack.c.l.s4 %v653_v22  ;;  %s438_s18 = sshll.u32 %s801_s21, 3  ;;  %vm289_vm0 = vcmask 1040384  }
  0x52   : > { %s442_s27 = sld [smem:[#allocation2 + $0x2]]  ;;  %v440_v3 = vld [vmem:[%s188_s23 + $0x2] ss:$4 sm:$0xf]  ;;  %v249_v10 = vshrl.u32 %v248_v2, 7  ;;  %s211_s6 = scalar_lea.vmem [#allocation9], %s438_s18 }
  0x53   : > { %s230_s28 = sld [smem:[#allocation7]]  ;;  %v302_v31 = vunpack.c.0.s8 %v301_v23  ;;  %s332_s10 = sshll.u32 %s211_s6, 4  ;;  %s811_s10 = int_to_ptr.vmem [resolvable:$true] %s332_s10 }
  0x54   : > { %s443_s29 = sld [smem:[#allocation2 + $0x3]]  ;;  %v250_v20 = vsub.s32 0, %v249_v10  ;;  %v254_v21 = vsub.s32 1, %v249_v10  ;;  %v258_v26 = vsub.s32 2, %v249_v10  ;;  %v262_v27 = vsub.s32 3, %v249_v10  ;;  %s453_s8 = sshll.u32 %s696_s16, 7 }
  0x55   : > { %s444_s30 = sld [smem:[#allocation2 + $0x4]]  ;;  %v305_v40 = vsub.s32 %v302_v31, %v249_v10  ;;  %s330_s20 = scalar_lea.hbm %s854_s3, %s453_s8 }
  0x56   : > { %v220_v4 = vstv %s219_s25  ;;  %s445_s4 = sld [smem:[#allocation2 + $0x5]]  ;;  %s318_s22 = scalar_lea.sflag [#allocation4], %s801_s21 }
  0x57   : > { %v221_v5 = vmul.f32 %v220_v4, %v214_v0  ;;  %v223_v6 = vstv %s441_s26  ;;  %s446_s5 = sld [smem:[#allocation7 + $0x1]]  ;;  %s576_s23 = scalar_lea.vmem %s811_s10, 128 }
  0x58   : > { %v224_v7 = vmul.f32 %v439_v1, %v223_v6  ;;  %v227_v8 = vstv %s442_s27  ;;  %p577_p8 = scmp.ne.s32.totalorder %s811_s10, %s576_s23  ;;  %p872_p3 = scmp.ne.s32.totalorder %s864_s9, 0 }
  0x59   : > { %v228_v9 = vmul.f32 %v440_v3, %v227_v8  ;;  %v231_v13 = vstv %s230_s28  ;;  %s654_s16 = smov [#allocation9]  }
  0x5a   : > { %v225_v11 = vadd.f32 %v224_v7, %v221_v5  ;;  %v234_v12 = vstv %s443_s29  ;;  %p578_p11 = pnand %p577_p8, %p872_p3  ;;  %s580_s25 = sshll.u32 %s654_s16, 4  ;;  %s581_s25 = int_to_ptr.vmem [resolvable:$false] %s580_s25 }
  0x5b   : > { %v235_v14 = vmul.f32 %v234_v12, %v214_v0  ;;  %v237_v15 = vstv %s444_s30  ;;  %s582_s26 = scalar_lea.vmem %s581_s25, 256  ;;  %p583_p9 = scmp.lt.s32.totalorder %s811_s10, %s581_s25 }
  0x5c   : > { %v229_v16 = vadd.f32 %v228_v9, %v225_v11  ;;  %v238_v17 = vmul.f32 %v439_v1, %v237_v15  ;;  %v241_v18 = vstv %s445_s4  ;;  %p579_p0 = pneg %p578_p11  ;;  %p584_p1 = scmp.lt.s32.totalorder %s582_s26, %s576_s23 }
  0x5d   : > { %v242_v19 = vmul.f32 %v440_v3, %v241_v18  ;;  %v245_v28 = vstv %s446_s5 }
  0x5e   : > { %v232_v24 = vadd.f32 %v231_v13, %v229_v16  ;;  %v239_v25 = vadd.f32 %v238_v17, %v235_v14  ;;  %p585_p2 = por %p584_p1, %p583_p9 }
  0x60   : > { %v243_v29 = vadd.f32 %v242_v19, %v239_v25  ;;  %v251_v30 = vrot.slane %v232_v24, %v250_v20  ;;  %v255_v33 = vrot.slane %v232_v24, %v254_v21  ;;  %v259_v34 = vrot.slane %v232_v24, %v258_v26  ;;  %p586_p5 = pnand %p585_p2, %p579_p0 }
  0x61   : > { %v263_v35 = vrot.slane %v232_v24, %v262_v27 }
  0x62   : > { %v246_v32 = vadd.f32 %v245_v28, %v243_v29 }
  0x64   : > { %v272_v36 = vrot.slane %v246_v32, %v250_v20  ;;  %v276_v37 = vrot.slane %v246_v32, %v254_v21  ;;  %v280_v38 = vrot.slane %v246_v32, %v258_v26  ;;  %v284_v39 = vrot.slane %v246_v32, %v262_v27 }
  0x66   : > { %v290_v41 = vsel %vm289_vm0, %v251_v30, %v272_v36  ;;  %v291_v42 = vsel %vm289_vm0, %v255_v33, %v276_v37  ;;  %v292_v43 = vsel %vm289_vm0, %v259_v34, %v280_v38  ;;  %v293_v44 = vsel %vm289_vm0, %v263_v35, %v284_v39 }
  0x67   : > { %v298_v45 = vcombine.low %v290_v41, %v291_v42  ;;  %v299_v46 = vcombine.low %v292_v43, %v293_v44 }
  0x69   : > { %v306_v47 = vrot.slane %v298_v45, %v305_v40  ;;  %v313_v48 = vrot.slane %v299_v46, %v305_v40 }
  0x6b   : > { %v314_v49 = vcombine.low %v306_v47, %v313_v48 }
  0x6d   : > { %316 = vst [vmem:[%s211_s6] sm:$0xff] %v314_v49 }
  0x6e   : > { %589 = shalt.err (!%p586_p5)
}
  0x6f   : > { %s590_s27 = scalar_lea.hbm %s330_s20, 128  ;;  %s594_s29 = scalar_lea.hbm %s854_s3, 256 }
  0x70   : > { %p591_p7 = scmp.ne.s32.totalorder %s330_s20, %s590_s27  ;;  %p595_p12 = scmp.lt.s32.totalorder %s330_s20, %s854_s3 }
  0x71   : > { %p596_p13 = scmp.lt.s32.totalorder %s594_s29, %s590_s27 }
  0x72   : > { %p592_p10 = pnand %p591_p7, %p872_p3 }
  0x73   : > { %p597_p4 = por %p596_p13, %p595_p12 }
  0x74   : > { %p593_p6 = pneg %p592_p10 }
  0x76   : > { %p598_p8 = pnand %p597_p4, %p593_p6 }
  0x78   : > { %601 = shalt.err (!%p598_p8)
}
  0x79   : > { %464 = dma.vmem_to_hbm [thread:$0]  (%p872_p3), %s811_s10, 128, %s330_s20, %s318_s22  }
  0x7a PF: > { %s344_s5 = sand.u32 1, %s636_s12   ;;  %p873_p11 = scmp.ne.s32.totalorder %s860_s19, 0 }
  0x7b   : > { %p874_p0 = scmp.ge.s32.totalorder %s648_s15, 2  ;;  %s345_s18 = scalar_lea.sflag [#allocation4], %s344_s5 }
  0x7d   : > { %p478_p9 = pnand %p874_p0, %p873_p11 }
  0x7f   : > { %p479_p1 = pneg %p478_p9 }
  0x81   : > { %631 = dma.done.wait (%p479_p1), %s345_s18, 128  }
  0x82   : > { %633 = vsyncadd (%p479_p1), %s345_s18, 4294967168  ;;  %p18_p2 = scmp.ge.s32.totalorder %s726_s24, 4   ;;  %s875_s12 = smov %s640_s13 }
  0x83   : > { %s876_s13 = smov %s644_s14  ;;  %s877_s14 = smov %s753_s7 }
  0x84   : > { %s878_s15 = smov %s726_s24  ;;  %20 = sbr.rel (!%p18_p2) target bundleno = 7 (0x7), region = 89 }
  0x89   :  { %350 = vsyncpa [#allocation3], 1 }
  0x8a   :  { %352 = vsyncpa [#allocation3 + $0x1], 1 }
  0x8b   :  { %353 = vsyncpa [#allocation4], 1 }
  0x8c   :  { %355 = vsyncpa [#allocation4 + $0x1], 1 }
  0x8d   :  { %356 = vsyncpa [#allocation5], 1 }
  0x8e   :  { %358 = vsyncpa [#allocation5 + $0x1], 1 }
  0x8f   :  { %359 = vsyncpa [#allocation6], 1 }
  0x90   :  { %361 = vsyncpa [#allocation6 + $0x1], 1 }

</bundles_post_ra>
